<compile_context>
chip_gen: v7x
topology: tpu7x:2x2x1
jax: 0.10.0
libtpu: 0.0.40
codegen_flags: <defaults>
</compile_context>

<pallas_src>
import math

import numpy as np
import jax
import jax.numpy as jnp
from jax.experimental import pallas as pl
from jax.experimental.pallas import tpu as pltpu


def _round_up(x, m):
    return ((x + m - 1) // m) * m


def make_sce_kernel(n_valid, tiles_per_shard, tile_n, alpha, beta, A, mask_tail):
    # log(clip(onehot, A, 1)) == (1 - onehot) * log(A) requires 0 < A <= 1.
    assert 0.0 < float(A) <= 1.0, "SCELoss kernel assumes 0 < A <= 1"

    # Plain Python floats / ints -> inlined literals.
    ALPHA = float(alpha)
    BETA = float(beta)
    NEG_LOG_A = -math.log(float(A))
    INV_N = 1.0 / float(n_valid)
    N_VALID = int(n_valid)
    TPS = int(tiles_per_shard)
    TILE_N = int(tile_n)

    def sce_kernel(pred_ref, labels_ref, out_ref, acc_ref):
        s = pl.program_id(0)          # shard (parallel axis; megacore on v7x)
        j = pl.program_id(1)          # tile within shard (reduction axis)

        @pl.when(j == 0)
        def _init():
            acc_ref[...] = jnp.zeros_like(acc_ref)

        pred = pred_ref[...].astype(jnp.float32)       # (C, T): classes x samples
        labels = labels_ref[...]                       # (1, T) int32
        C, T = pred.shape

        if mask_tail:
            # Global column index of each lane; mask ragged tail / phantom tiles.
            col0 = (s * TPS + j) * TILE_N
            col = col0 + jax.lax.broadcasted_iota(jnp.int32, (1, T), 1)
            valid = col < N_VALID
            pred = jnp.where(valid, pred, 0.0)         # keep tail garbage out of exp

        # Numerically stable softmax pieces (class dim on sublanes).
        m = jnp.max(pred, axis=0, keepdims=True)       # (1, T)
        e = jnp.exp(pred - m)                          # (C, T)  only big EUP op
        sumexp = jnp.sum(e, axis=0, keepdims=True)     # (1, T), >= 1.0
        log_z = m + jnp.log(sumexp)                    # (1, T)

        cls = jax.lax.broadcasted_iota(jnp.int32, (C, T), 0)
        onehot = cls == labels                         # (C, T) bool

        # CE row = logZ - logit[label]   (no full log_softmax materialized)
        label_logit = jnp.sum(jnp.where(onehot, pred, 0.0), axis=0, keepdims=True)
        ce_row = log_z - label_logit                   # (1, T)

        # RCE row = -log(A) * (sum_c clip(p) - clip(p)[label])
        inv = pl.reciprocal(sumexp, approx=False)      # exact; (1,T) only
        p = jnp.maximum(e * inv, 1e-7)                 # upper clip at 1.0 is a no-op
        sum_clip = jnp.sum(p, axis=0, keepdims=True)   # (1, T)
        # Row-wise identity: p[label] = exp(label_logit - logZ); avoids a
        # (C,T) select + sublane reduction (VALU trim for v7x/v6e).
        label_clip = jnp.clip(jnp.exp(label_logit - log_z), 1e-7, 1.0)
        rce_row = NEG_LOG_A * (sum_clip - label_clip)  # (1, T)

        contrib = ALPHA * ce_row + BETA * rce_row
        if mask_tail:
            contrib = jnp.where(valid, contrib, 0.0)
        acc_ref[...] += contrib                        # per-lane partial sums

        @pl.when(j == pl.num_programs(1) - 1)
        def _finalize():
            partial = jnp.sum(acc_ref[...]) * INV_N    # this shard's share of the mean
            out_ref[...] = jnp.full(out_ref.shape, partial, dtype=jnp.float32)

    return sce_kernel


def sce_loss_cn(logits_cn, labels, num_classes=10, alpha=1.0, beta=1.0,
                A=float(np.exp(-4.0)), max_tile_n=65536, num_shards=2):
    """SCE loss with logits in lane-dense (C, N) layout (recommended hot path).

    logits_cn: (C, N) float logits (f32 or bf16, passed through unconverted).
    labels:    (N,) int class ids.
    Returns a scalar f32 loss identical to the PyTorch SCELoss forward.
    """
    C, N = logits_cn.shape
    assert C == num_classes
    assert labels.shape == (N,)

    labels_row = jnp.asarray(labels).astype(jnp.int32).reshape(1, N)

    # Lane-aligned tile of batch columns; big tiles amortize per-step overhead.
    tile_n = int(min(int(max_tile_n), _round_up(N, 128)))
    tile_n = max(128, (tile_n // 128) * 128)

    n_blocks = pl.cdiv(N, tile_n)                      # real tiles (ragged tail ok)
    n_shards = max(1, min(int(num_shards), n_blocks))  # 2-TC split (v7x); 1 if tiny
    tps = pl.cdiv(n_blocks, n_shards)                  # tiles per shard
    needs_clamp = (n_shards * tps) != n_blocks         # phantom tiles on last shard
    mask_tail = (n_shards * tps * tile_n) != N         # any column masking needed?

    last_block = n_blocks - 1

    def _block_idx(s, j):
        b = s * tps + j
        if needs_clamp:
            b = jnp.minimum(b, last_block)             # phantom tiles re-read last
        return b                                       # block; kernel masks them out

    kernel = make_sce_kernel(N, tps, tile_n, alpha, beta, A, mask_tail)

    out = pl.pallas_call(
        kernel,
        out_shape=jax.ShapeDtypeStruct((n_shards, 8, 128), jnp.float32),
        grid_spec=pltpu.PrefetchScalarGridSpec(
            num_scalar_prefetch=0,
            grid=(n_shards, tps),
            in_specs=[
                pl.BlockSpec((C, tile_n), lambda s, j: (0, _block_idx(s, j))),
                pl.BlockSpec((1, tile_n), lambda s, j: (0, _block_idx(s, j))),
            ],
            out_specs=pl.BlockSpec((1, 8, 128), lambda s, j: (s, 0, 0)),
            scratch_shapes=[pltpu.VMEM((1, tile_n), jnp.float32)],
        ),
        compiler_params=pltpu.CompilerParams(
            # shard axis parallel (megacore on v7x), tile axis is a reduction
            dimension_semantics=("parallel", "arbitrary"),
            vmem_limit_bytes=48 * 1024 * 1024,   # fits v7x 64 MiB; plenty on v5e/v6e
        ),
    )(logits_cn, labels_row)

    # One scalar add per shard in XLA.
    return jnp.sum(out[:, 0, 0])


def sce_loss(pred, labels, **kwargs):
    """Module-compatible API: pred is (N, C) logits like the PyTorch SCELoss.

    Note: this does one XLA transpose (a full HBM read+write of the logits).
    On the hot path, have the producer emit logits as (C, N) (e.g. keep the
    classifier-head output transposed / fold it into the last matmul) and call
    sce_loss_cn() directly.
    """
    return sce_loss_cn(jnp.asarray(pred).T, labels, **kwargs)


def sce_loss_ref(pred, labels, num_classes=10, alpha=1.0, beta=1.0,
                 A=float(np.exp(-4.0))):
    """Pure-JAX reference matching the PyTorch module (pred is (N, C))."""
    logp = jax.nn.log_softmax(pred, axis=1)
    onehot = jax.nn.one_hot(labels, num_classes, dtype=jnp.float32)
    ce = -jnp.mean(jnp.sum(onehot * logp, axis=1))
    p = jnp.clip(jax.nn.softmax(pred, axis=1), 1e-7, 1.0)
    ohc = jnp.clip(onehot, A, 1.0)
    rce = -jnp.sum(p * jnp.log(ohc), axis=1)
    return alpha * ce + beta * jnp.mean(rce)


if __name__ == "__main__":
    num_classes = 10
    key = jax.random.PRNGKey(0)
    k1, k2, k3, k4, k5, k6 = jax.random.split(key, 6)

    # 1) Small single-tile case on the lane-dense (C, N) fast path; exercises
    #    in-kernel ragged-tail masking (8 valid columns in a 128-wide tile).
    N1 = 8
    logits_cn1 = jax.random.normal(k1, (num_classes, N1), dtype=jnp.float32)
    labels1 = jax.random.randint(k2, (N1,), 0, num_classes, dtype=jnp.int32)
    loss1 = jax.block_until_ready(
        sce_loss_cn(logits_cn1, labels1, num_classes=num_classes))
    ref1 = sce_loss_ref(logits_cn1.T, labels1, num_classes=num_classes)
    np.testing.assert_allclose(np.asarray(loss1), np.asarray(ref1),
                               rtol=1e-5, atol=1e-5)

    # 2) Multi-tile + 2-shard case (3 real tiles, one clamped phantom tile,
    #    ragged tail, per-shard partial outputs, non-default alpha/beta).
    N2 = 300
    logits_cn2 = jax.random.normal(k3, (num_classes, N2), dtype=jnp.float32)
    labels2 = jax.random.randint(k4, (N2,), 0, num_classes, dtype=jnp.int32)
    loss2 = jax.block_until_ready(
        sce_loss_cn(logits_cn2, labels2, num_classes=num_classes,
                    alpha=0.5, beta=2.0, max_tile_n=128))
    ref2 = sce_loss_ref(logits_cn2.T, labels2, num_classes=num_classes,
                        alpha=0.5, beta=2.0)
    np.testing.assert_allclose(np.asarray(loss2), np.asarray(ref2),
                               rtol=1e-5, atol=1e-5)

    # 3) Module-compatible (N, C) path with bf16 logits passed straight through
    #    (kernel upcasts internally; reference runs on the same bf16 values).
    N3 = 64
    pred_nc3 = jax.random.normal(k5, (N3, num_classes),
                                 dtype=jnp.float32).astype(jnp.bfloat16)
    labels3 = jax.random.randint(k6, (N3,), 0, num_classes, dtype=jnp.int32)
    loss3 = jax.block_until_ready(
        sce_loss(pred_nc3, labels3, num_classes=num_classes))
    ref3 = sce_loss_ref(pred_nc3.astype(jnp.float32), labels3,
                        num_classes=num_classes)
    np.testing.assert_allclose(np.asarray(loss3), np.asarray(ref3),
                               rtol=1e-5, atol=1e-5)

    print("KERNEL_OK")
</pallas_src>

<mosaic_0001>
module attributes {stable_mosaic.version = 11 : i64} {
  func.func @sce_kernel(%arg0: i32, %arg1: i32, %arg2: memref<10x128xf32, #tpu.memory_space<vmem>>, %arg3: memref<1x128xi32, #tpu.memory_space<vmem>>, %arg4: memref<1x8x128xf32, #tpu.memory_space<vmem>>, %arg5: memref<1x128xf32, #tpu.memory_space<vmem>>) attributes {dimension_semantics = [#tpu.dimension_semantics<parallel>, #tpu.dimension_semantics<arbitrary>], iteration_bounds = array<i64: 1, 1>, scalar_prefetch = 0 : i64, scratch_operands = 1 : i64, tpu.core_type = #tpu.core_type<tc>, window_params = [{transform_indices = @transform_0, window_bounds = array<i64: 10, 128>}, {transform_indices = @transform_1, window_bounds = array<i64: 1, 128>}, {transform_indices = @transform_2, window_bounds = array<i64: 1, 8, 128>}]} {
    %c0_i32 = arith.constant 0 : i32
    %0 = arith.cmpi eq, %arg1, %c0_i32 : i32
    %1 = arith.extui %0 : i1 to i32
    %c0_i32_0 = arith.constant 0 : i32
    %2 = arith.cmpi ne, %1, %c0_i32_0 : i32
    scf.if %2 {
      %cst_22 = arith.constant 0.000000e+00 : f32
      %63 = vector.broadcast %cst_22 : f32 to vector<1x128xf32>
      %c0_23 = arith.constant 0 : index
      %c0_24 = arith.constant 0 : index
      %64 = vector.load %arg5[%c0_23, %c0_24] : memref<1x128xf32, #tpu.memory_space<vmem>>, vector<1x128xf32>
      tpu.vector_store %arg5[%c0_23, %c0_24], %63 {strides = array<i32>} : memref<1x128xf32, #tpu.memory_space<vmem>>, vector<1x128xf32>,
    } else {
    }
    %c0 = arith.constant 0 : index
    %c0_1 = arith.constant 0 : index
    %3 = vector.load %arg2[%c0, %c0_1] : memref<10x128xf32, #tpu.memory_space<vmem>>, vector<10x128xf32>
    %c0_2 = arith.constant 0 : index
    %c0_3 = arith.constant 0 : index
    %4 = vector.load %arg3[%c0_2, %c0_3] : memref<1x128xi32, #tpu.memory_space<vmem>>, vector<1x128xi32>
    %c1_i32 = arith.constant 1 : i32
    %5 = arith.muli %arg0, %c1_i32 : i32
    %6 = arith.addi %5, %arg1 : i32
    %c128_i32 = arith.constant 128 : i32
    %7 = arith.muli %6, %c128_i32 : i32
    %8 = tpu.iota {dimensions = array<i32: 1>} : vector<1x128xi32>
    %9 = vector.broadcast %7 : i32 to vector<1x128xi32>
    %10 = arith.addi %9, %8 : vector<1x128xi32>
    %c8_i32 = arith.constant 8 : i32
    %11 = vector.broadcast %c8_i32 : i32 to vector<1x128xi32>
    %12 = arith.cmpi slt, %10, %11 : vector<1x128xi32>
    %cst = arith.constant 0.000000e+00 : f32
    %13 = vector.shape_cast %12 : vector<1x128xi1> to vector<1x128xi1>
    %14 = vector.broadcast %13 : vector<1x128xi1> to vector<10x128xi1>
    %15 = vector.broadcast %cst : f32 to vector<10x128xf32>
    %16 = arith.select %14, %3, %15 : vector<10x128xi1>, vector<10x128xf32>
    %cst_4 = arith.constant dense<0xFF800000> : vector<128xf32>
    %17 = vector.multi_reduction <maximumf>, %16, %cst_4 [0] : vector<10x128xf32> to vector<128xf32>
    %18 = vector.shape_cast %17 : vector<128xf32> to vector<1x128xf32>
    %19 = vector.broadcast %18 : vector<1x128xf32> to vector<10x128xf32>
    %20 = arith.subf %16, %19 : vector<10x128xf32>
    %21 = math.exp %20 : vector<10x128xf32>
    %cst_5 = arith.constant dense<0.000000e+00> : vector<128xf32>
    %22 = vector.multi_reduction <add>, %21, %cst_5 [0] : vector<10x128xf32> to vector<128xf32>
    %23 = vector.shape_cast %22 : vector<128xf32> to vector<1x128xf32>
    %24 = math.log %23 : vector<1x128xf32>
    %25 = arith.addf %18, %24 : vector<1x128xf32>
    %26 = tpu.iota {dimensions = array<i32: 0>} : vector<10x128xi32>
    %27 = vector.broadcast %4 : vector<1x128xi32> to vector<10x128xi32>
    %28 = arith.cmpi eq, %26, %27 : vector<10x128xi32>
    %cst_6 = arith.constant 0.000000e+00 : f32
    %29 = vector.broadcast %cst_6 : f32 to vector<10x128xf32>
    %30 = arith.select %28, %16, %29 : vector<10x128xi1>, vector<10x128xf32>
    %cst_7 = arith.constant dense<0.000000e+00> : vector<128xf32>
    %31 = vector.multi_reduction <add>, %30, %cst_7 [0] : vector<10x128xf32> to vector<128xf32>
    %32 = vector.shape_cast %31 : vector<128xf32> to vector<1x128xf32>
    %33 = arith.subf %25, %32 : vector<1x128xf32>
    %34 = tpu.reciprocal %23 : vector<1x128xf32> -> vector<1x128xf32>
    %35 = vector.broadcast %34 : vector<1x128xf32> to vector<10x128xf32>
    %36 = arith.mulf %21, %35 : vector<10x128xf32>
    %cst_8 = arith.constant 1.000000e-07 : f32
    %37 = vector.broadcast %cst_8 : f32 to vector<10x128xf32>
    %38 = arith.maximumf %36, %37 : vector<10x128xf32>
    %cst_9 = arith.constant dense<0.000000e+00> : vector<128xf32>
    %39 = vector.multi_reduction <add>, %38, %cst_9 [0] : vector<10x128xf32> to vector<128xf32>
    %40 = vector.shape_cast %39 : vector<128xf32> to vector<1x128xf32>
    %41 = arith.subf %32, %25 : vector<1x128xf32>
    %42 = math.exp %41 : vector<1x128xf32>
    %cst_10 = arith.constant 1.000000e-07 : f32
    %cst_11 = arith.constant 1.000000e+00 : f32
    %43 = vector.broadcast %cst_10 : f32 to vector<1x128xf32>
    %44 = arith.maximumf %43, %42 : vector<1x128xf32>
    %45 = vector.broadcast %cst_11 : f32 to vector<1x128xf32>
    %46 = arith.minimumf %45, %44 : vector<1x128xf32>
    %47 = arith.subf %40, %46 : vector<1x128xf32>
    %cst_12 = arith.constant 4.000000e+00 : f32
    %48 = vector.broadcast %cst_12 : f32 to vector<1x128xf32>
    %49 = arith.mulf %48, %47 : vector<1x128xf32>
    %cst_13 = arith.constant 1.000000e+00 : f32
    %50 = vector.broadcast %cst_13 : f32 to vector<1x128xf32>
    %51 = arith.mulf %50, %33 : vector<1x128xf32>
    %cst_14 = arith.constant 1.000000e+00 : f32
    %52 = vector.broadcast %cst_14 : f32 to vector<1x128xf32>
    %53 = arith.mulf %52, %49 : vector<1x128xf32>
    %54 = arith.addf %51, %53 : vector<1x128xf32>
    %cst_15 = arith.constant 0.000000e+00 : f32
    %55 = vector.broadcast %cst_15 : f32 to vector<1x128xf32>
    %56 = arith.select %12, %54, %55 : vector<1x128xi1>, vector<1x128xf32>
    %c0_16 = arith.constant 0 : index
    %c0_17 = arith.constant 0 : index
    %57 = vector.load %arg5[%c0_16, %c0_17] : memref<1x128xf32, #tpu.memory_space<vmem>>, vector<1x128xf32>
    %58 = arith.addf %57, %56 : vector<1x128xf32>
    %c0_18 = arith.constant 0 : index
    %c0_19 = arith.constant 0 : index
    %59 = vector.load %arg5[%c0_18, %c0_19] : memref<1x128xf32, #tpu.memory_space<vmem>>, vector<1x128xf32>
    tpu.vector_store %arg5[%c0_18, %c0_19], %58 {strides = array<i32>} : memref<1x128xf32, #tpu.memory_space<vmem>>, vector<1x128xf32>,
    %c0_i32_20 = arith.constant 0 : i32
    %60 = arith.cmpi eq, %arg1, %c0_i32_20 : i32
    %61 = arith.extui %60 : i1 to i32
    %c0_i32_21 = arith.constant 0 : i32
    %62 = arith.cmpi ne, %61, %c0_i32_21 : i32
    scf.if %62 {
      %c0_22 = arith.constant 0 : index
      %c0_23 = arith.constant 0 : index
      %63 = vector.load %arg5[%c0_22, %c0_23] : memref<1x128xf32, #tpu.memory_space<vmem>>, vector<1x128xf32>
      %64 = vector.shape_cast %63 : vector<1x128xf32> to vector<1x1x128xf32>
      %cst_24 = arith.constant dense<0.000000e+00> : vector<1xf32>
      %65 = vector.multi_reduction <add>, %64, %cst_24 [1, 2] : vector<1x1x128xf32> to vector<1xf32>
      %66 = vector.shape_cast %65 : vector<1xf32> to vector<1x1x1xf32>
      %67 = vector.extract %66[0, 0, 0] : f32 from vector<1x1x1xf32>
      %cst_25 = arith.constant 1.250000e-01 : f32
      %68 = arith.mulf %67, %cst_25 : f32
      %69 = vector.broadcast %68 : f32 to vector<1x8x128xf32>
      %c0_26 = arith.constant 0 : index
      %c0_27 = arith.constant 0 : index
      %c0_28 = arith.constant 0 : index
      %70 = vector.load %arg4[%c0_26, %c0_27, %c0_28] : memref<1x8x128xf32, #tpu.memory_space<vmem>>, vector<1x8x128xf32>
      tpu.vector_store %arg4[%c0_26, %c0_27, %c0_28], %69 {strides = array<i32>} : memref<1x8x128xf32, #tpu.memory_space<vmem>>, vector<1x8x128xf32>,
    } else {
    }
    return
  }
  func.func @transform_0(%arg0: i32, %arg1: i32) -> (i32, i32) {
    %c1_i32 = arith.constant 1 : i32
    %0 = arith.muli %arg0, %c1_i32 : i32
    %1 = arith.addi %0, %arg1 : i32
    %c0_i32 = arith.constant 0 : i32
    %c0_i32_0 = arith.constant 0 : i32
    return %c0_i32, %1 : i32, i32
  }
  func.func @transform_1(%arg0: i32, %arg1: i32) -> (i32, i32) {
    %c1_i32 = arith.constant 1 : i32
    %0 = arith.muli %arg0, %c1_i32 : i32
    %1 = arith.addi %0, %arg1 : i32
    %c0_i32 = arith.constant 0 : i32
    %c0_i32_0 = arith.constant 0 : i32
    return %c0_i32, %1 : i32, i32
  }
  func.func @transform_2(%arg0: i32, %arg1: i32) -> (i32, i32, i32) {
    %c0_i32 = arith.constant 0 : i32
    %c0_i32_0 = arith.constant 0 : i32
    %c0_i32_1 = arith.constant 0 : i32
    return %arg0, %c0_i32, %c0_i32_0 : i32, i32, i32
  }
}

</mosaic_0001>

<bundles_post_ra>
// kernel: tpu_custom_call.1
= control target key start
LH: loop header
LB: loop body
LE: loop exit
PB: predicated region body
PF: predicated region fallthrough
CT: control target
= control target key end

     0   :  { %v53_v0 = vlaneseq  ;;  %v213_v1 = vmov 0.0   ;;  %s264_s0 = inlined_call_operand.vmem [shape: f32[10,8], index: 0, kind: input, shape index: {}]   ;;  %s265_s1 = inlined_call_operand.vmem [shape: s32[1,8], index: 1, kind: input, shape index: {}]   ;;  %s266_s2 = inlined_call_operand.hbm [shape: f32[1,8,128], index: 2, kind: output, shape index: {}]  }
   0x1   :  { %47 = vst [vmem:[#allocation2] sm:$0x1] %v213_v1 }
   0x2   :  { %7 = vsyncpa [#allocation4], 0  ;;  %v48_v2 = vld [vmem:[%s264_s0] sm:$0xff]  ;;  %v49_v3 = vld [vmem:[%s264_s0 + $0x8] sm:$0x3]  ;;  %v236_v4 = vand.u32 127, %v53_v0 }
   0x3   :  { %vm62_vm0 = vcmask 1041408   ;;  %v89_v17 = vshrl.u32 %v53_v0, 7  ;;  %v174_v21 = vld [vmem:[%s265_s1] ss:$0 sm:$0xff]  ;;  %vm137_vm4 = vcmask 1040384   ;;  %s214_s1 = smov [#allocation3]  }
   0x4   :  { %vm57_vm1 = vcmp.lt.s32.totalorder %v236_v4, 8  ;;  %s157_s14 = sshll.u32 %s214_s1, 4  ;;  %s158_s14 = int_to_ptr.vmem [resolvable:$true] %s157_s14 }
   0x5   :  { %v60_v5 = vsel %vm57_vm1, %v48_v2, 0.0  ;;  %v61_v6 = vsel %vm57_vm1, %v49_v3, 0.0  ;;  %v90_v20 = vadd.s32 8, %v89_v17  ;;  %vm95_vm3 = vcmp.eq.s32.totalorder %v89_v17, %v174_v21  ;;  %s189_s17 = scalar_lea.vmem %s158_s14, 128  ;;  %p194_p1 = scmp.lt.s32.totalorder %s158_s14, %s158_s14 }
   0x6   :  { %v63_v7 = vsel %vm62_vm0, %v61_v6, -inf  ;;  %v97_v25 = vsel %vm95_vm3, %v60_v5, 0.0  ;;  %p190_p0 = scmp.ne.s32.totalorder %s158_s14, %s189_s17  ;;  %p195_p2 = scmp.lt.s32.totalorder %s189_s17, %s189_s17 }
   0x7   :  { %v64_v8 = vmax.f32 %v60_v5, %v63_v7  ;;  %vm96_vm2 = vcmp.eq.s32.totalorder %v90_v20, %v174_v21 }
   0x8   :  { %v98_v22 = vsel %vm96_vm2, %v61_v6, 0.0  ;;  %v130_v3 = vld [vmem:[#allocation2] sm:$0x1]  ;;  %p196_p3 = por %p195_p2, %p194_p1 }
   0x9   :  { %v65_v9 = vrot.slane %v64_v8, 4  ;;  %v99_v26 = vsel %vm62_vm0, %v98_v22, 0.0 }
   0xa   :  { %v100_v29 = vadd.f32 %v99_v26, %v97_v25  ;;  %p197_p4 = pnand %p196_p3, %p190_p0 }
   0xb   :  { %v66_v10 = vmax.f32 %v64_v8, %v65_v9 }
   0xc   :  { %v101_v32 = vrot.slane %v100_v29, 4 }
   0xd   :  { %v67_v11 = vrot.slane %v66_v10, 2 }
   0xe   :  { %v102_v35 = vadd.f32 %v101_v32, %v100_v29 }
   0xf   :  { %v68_v12 = vmax.f32 %v66_v10, %v67_v11 }
  0x10   :  { %v103_v38 = vrot.slane %v102_v35, 2 }
  0x11   :  { %v69_v13 = vrot.slane %v68_v12, 1 }
  0x12   :  { %v104_v39 = vadd.f32 %v103_v38, %v102_v35 }
  0x13   :  { %v70_v14 = vmax.f32 %v68_v12, %v69_v13 }
  0x14   :  { %v105_v40 = vrot.slane %v104_v39, 1 }
  0x15   :  { %v71_v15 = vsub.f32 %v60_v5, %v70_v14  ;;  %v72_v16 = vsub.f32 %v61_v6, %v70_v14 }
  0x16   :  { %v106_v44 = vadd.f32 %v105_v40, %v104_v39 }
  0x17   :  { %v73_v18 = vmul.f32 1.442695, %v71_v15  ;;  %v75_v19 = vmul.f32 1.442695, %v72_v16 }
  0x19   :  { %179 = vpow2.f32 %v73_v18 }
  0x1a   :  { %181 = vpow2.f32 %v75_v19 }
  0x23   :  { %v180_v23 = vpop.eup %179 }
  0x24   :  { %v182_v24 = vpop.eup %181 }
  0x25   :  { %v77_v27 = vsel %vm62_vm0, %v182_v24, 0.0 }
  0x26   :  { %v78_v28 = vadd.f32 %v180_v23, %v77_v27 }
  0x28   :  { %v79_v30 = vrot.slane %v78_v28, 4 }
  0x2a   :  { %v80_v31 = vadd.f32 %v79_v30, %v78_v28 }
  0x2c   :  { %v81_v33 = vrot.slane %v80_v31, 2 }
  0x2e   :  { %v82_v34 = vadd.f32 %v81_v33, %v80_v31 }
  0x30   :  { %v83_v36 = vrot.slane %v82_v34, 1 }
  0x32   :  { %v84_v37 = vadd.f32 %v83_v36, %v82_v34 }
  0x34   :  { %183 = vlog2.f32 %v84_v37 }
  0x35   :  { %185 = vrcp.f32 %v84_v37 }
  0x3e   :  { %v184_v41 = vpop.eup %183 }
  0x3f   :  { %v186_v42 = vpop.eup %185  ;;  %v86_v43 = vmul.f32 0.6931472, %v184_v41 }
  0x40   :  { %v109_v45 = vmul.f32 %v186_v42, %v180_v23  ;;  %v110_v46 = vmul.f32 %v186_v42, %v182_v24 }
  0x41   :  { %v87_v47 = vadd.f32 %v86_v43, %v70_v14 }
  0x42   :  { %v111_v48 = vmax.f32 %v109_v45, 1e-07  ;;  %v112_v49 = vmax.f32 %v110_v46, 1e-07 }
  0x43   :  { %v121_v50 = vsub.f32 %v106_v44, %v87_v47  ;;  %v107_v63 = vsub.f32 %v87_v47, %v106_v44 }
  0x44   :  { %v113_v51 = vsel %vm62_vm0, %v112_v49, 0.0 }
  0x45   :  { %v114_v52 = vadd.f32 %v113_v51, %v111_v48  ;;  %v122_v53 = vmul.f32 1.442695, %v121_v50 }
  0x47   :  { %v115_v54 = vrot.slane %v114_v52, 4  ;;  %187 = vpow2.f32 %v122_v53 }
  0x49   :  { %v116_v55 = vadd.f32 %v115_v54, %v114_v52 }
  0x4b   :  { %v117_v56 = vrot.slane %v116_v55, 2 }
  0x4d   :  { %v118_v57 = vadd.f32 %v117_v56, %v116_v55 }
  0x4f   :  { %v119_v58 = vrot.slane %v118_v57, 1 }
  0x51   :  { %v188_v59 = vpop.eup %187  ;;  %v120_v60 = vadd.f32 %v119_v58, %v118_v57 }
  0x52   :  { %v124_v61 = vmax.f32 %v188_v59, 1e-07 }
  0x54   :  { %v125_v62 = vmin.f32 %v124_v61, 1.0 }
  0x56   :  { %v126_v0 = vsub.f32 %v120_v60, %v125_v62 }
  0x58   :  { %v127_v1 = vmul.f32 4.0, %v126_v0 }
  0x5a   :  { %v128_v2 = vadd.f32 %v127_v1, %v107_v63 }
  0x5c   :  { %v129_v5 = vsel %vm57_vm1, %v128_v2, 0.0 }
  0x5d   :  { %v131_v6 = vadd.f32 %v130_v3, %v129_v5 }
  0x5f   :  { %132 = vst [vmem:[#allocation2] sm:$0x1] %v131_v6 }
  0x66   :  { %v136_v7 = vld [vmem:[#allocation2] sm:$0x1] }
  0x67   :  { %v138_v8 = vsel %vm137_vm4, %v136_v7, 0.0 }
  0x68   :  { %139 = vadd.xlane.f32.xlu0 %v138_v8 }
  0xf5   :  { %v140_v9 = vpop.xlane.xlu0 %139 }
  0xf6   :  { %v141_v10 = vrot.slane %v140_v9, 4 }
  0xf8   :  { %v142_v11 = vadd.f32 %v141_v10, %v140_v9 }
  0xfa   :  { %v143_v12 = vrot.slane %v142_v11, 2 }
  0xfc   :  { %v144_v13 = vadd.f32 %v143_v12, %v142_v11 }
  0xfe   :  { %v145_v14 = vrot.slane %v144_v13, 1 }
 0x100   :  { %v146_v15 = vadd.f32 %v145_v14, %v144_v13 }
 0x102   :  { %175 = vpush %v146_v15 }
 0x133   :  { %s176_s15 = spop %175 }
 0x134   :  { %s148_s16 = smul.f32 0.125, %s176_s15 }
 0x136   :  { %v149_v4 = vstv %s148_s16 }
 0x137   :  { %150 = vst [vmem:[#allocation3] sm:$0xff] %v149_v4 }
 0x138   :  { %200 = shalt.err (!%p197_p4)
}
 0x139   :  { %s201_s20 = scalar_lea.hbm %s266_s2, 128 }
 0x13a   :  { %p202_p5 = scmp.ne.s32.totalorder %s266_s2, %s201_s20  ;;  %p205_p6 = scmp.lt.u32.totalorder %s201_s20, %s266_s2 }
 0x13c   :  { %p207_p7 = pnand %p205_p6, %p202_p5 }
 0x13e   :  { %210 = shalt.err (!%p207_p7)
}
 0x13f   :  { %160 = dma.vmem_to_hbm [thread:$0]  %s158_s14, 128, %s266_s2, [#allocation4]  }
 0x140   :  { %211 = dma.done.wait [#allocation4], 128  }
 0x141   :  { %212 = vsyncadd [#allocation4], 4294967168 }
 0x142   :  { %164 = vsyncpa [#allocation4], 1 }

</bundles_post_ra>
